<compile_context>
chip_gen: v7x
topology: tpu7x:2x2x1
jax: 0.10.0
libtpu: 0.0.40
codegen_flags: <defaults>
</compile_context>

<pallas_src>
import functools

import jax
import jax.numpy as jnp
from jax.experimental import pallas as pl
from jax.experimental.pallas import tpu as pltpu


def _round_up(x, m):
    return ((x + m - 1) // m) * m


# ----------------------------------------------------------------------------
# Kernels
# ----------------------------------------------------------------------------
def _loss_acc_kernel(logits_ref, labels_ref, loss_ref, acc_ref, acc_smem, *, inv_b):
    """Fused mean cross-entropy + argmax accuracy over one B-tile.

    logits_ref : VMEM [TB, N]  native dtype (batch on sublanes, classes on lanes)
    labels_ref : VMEM [TB, 1]  int32 (padded rows hold -1)
    loss_ref   : SMEM [1, 1]   float32 output (written at last grid step)
    acc_ref    : SMEM [1, 1]   float32 output (written at last grid step)
    acc_smem   : SMEM [2]      float32 scratch: [nll_sum, correct_count]
    """
    i = pl.program_id(0)

    @pl.when(i == 0)
    def _():
        acc_smem[0] = 0.0
        acc_smem[1] = 0.0

    logits = logits_ref[...].astype(jnp.float32)              # (TB, N) f32
    labels = labels_ref[...]                                   # (TB, 1) int32
    tb, n_cls = logits.shape

    # Numerically-stable log-softmax over the class (lane) axis.
    m = jnp.max(logits, axis=1, keepdims=True)                 # (TB, 1)
    z = logits - m                                             # (TB, N)
    lse = jnp.log(jnp.sum(jnp.exp(z), axis=1, keepdims=True))  # (TB, 1)
    logp = z - lse                                             # (TB, N)

    # One-hot gather of the target log-probability.  Pad / out-of-range
    # labels (-1) match no class and therefore contribute exactly 0.
    cls_ids = jax.lax.broadcasted_iota(jnp.int32, (tb, n_cls), 1)
    onehot = (cls_ids == labels).astype(jnp.float32)           # (TB, N)
    nll_sum = -jnp.sum(onehot * logp)                          # scalar

    # argmax over the class axis (first maximal index), computed from the
    # logits already resident in VMEM (no separate argmax op / HBM traffic).
    is_max = logits == m                                       # (TB, N)
    neg_idx = jnp.where(is_max, -cls_ids, -n_cls)              # (TB, N) int32
    pred = -jnp.max(neg_idx, axis=1, keepdims=True)            # (TB, 1) smallest argmax
    correct = jnp.sum((pred == labels).astype(jnp.float32))    # scalar

    acc_smem[0] += nll_sum
    acc_smem[1] += correct

    @pl.when(i == pl.num_programs(0) - 1)
    def _():
        loss_ref[0, 0] = acc_smem[0] * inv_b
        acc_ref[0, 0] = acc_smem[1] * inv_b


def _accuracy_kernel(pred_ref, label_ref, acc_ref, acc_smem, *, inv_b):
    """Mean of (pred == label) over a fully packed [TR, 128] int32 tile."""
    i = pl.program_id(0)

    @pl.when(i == 0)
    def _():
        acc_smem[0] = 0.0

    eq = (pred_ref[...] == label_ref[...]).astype(jnp.float32)
    acc_smem[0] += jnp.sum(eq)

    @pl.when(i == pl.num_programs(0) - 1)
    def _():
        acc_ref[0, 0] = acc_smem[0] * inv_b


# ----------------------------------------------------------------------------
# Wrappers
# ----------------------------------------------------------------------------
def loss_and_accuracy(logits, label, *, tb=None):
    """logits: (..., N) float, label: (...) int -> (mean CE loss, argmax accuracy)."""
    n_cls = logits.shape[-1]
    logits2d = jnp.reshape(logits, (-1, n_cls))                # [B, N], native dtype
    labels1d = jnp.reshape(label, (-1,)).astype(jnp.int32)     # [B]
    b = logits2d.shape[0]

    # Tile over the batch (sublane) axis.  Budget ~2 MiB per logits block in
    # VMEM (lane dim is padded to 128 internally), x2 for double buffering,
    # which stays inside the scoped VMEM limit on v5e/v6e and v7x (64 MiB).
    itemsize = jnp.dtype(logits.dtype).itemsize
    lanes_pad = _round_up(n_cls, 128)
    if tb is None:
        max_tb = (2 * 1024 * 1024) // max(1, lanes_pad * itemsize)
        max_tb = max(8, (max_tb // 8) * 8)
        tb = min(_round_up(b, 8), max_tb)
    else:
        tb = _round_up(tb, 8)
    b_pad = _round_up(b, tb)

    # Layout plumbing only: pad batch rows with 0 logits / -1 labels (padded
    # rows contribute nothing to either accumulator).  No transpose.
    logits_p = jnp.pad(logits2d, ((0, b_pad - b), (0, 0)))
    labels_col = jnp.pad(labels1d, (0, b_pad - b), constant_values=-1)
    labels_col = jnp.reshape(labels_col, (b_pad, 1))

    grid = (b_pad // tb,)
    kernel = functools.partial(_loss_acc_kernel, inv_b=1.0 / float(b))
    loss, acc = pl.pallas_call(
        kernel,
        out_shape=(jax.ShapeDtypeStruct((1, 1), jnp.float32),
                   jax.ShapeDtypeStruct((1, 1), jnp.float32)),
        grid=grid,
        in_specs=[
            pl.BlockSpec((tb, n_cls), lambda i: (i, 0)),
            pl.BlockSpec((tb, 1), lambda i: (i, 0)),
        ],
        out_specs=(
            pl.BlockSpec((1, 1), lambda i: (0, 0),
                         memory_space=pltpu.MemorySpace.SMEM),
            pl.BlockSpec((1, 1), lambda i: (0, 0),
                         memory_space=pltpu.MemorySpace.SMEM),
        ),
        scratch_shapes=[pltpu.SMEM((2,), jnp.float32)],
        compiler_params=pltpu.CompilerParams(
            dimension_semantics=("arbitrary",)),
        cost_estimate=pl.CostEstimate(
            flops=6 * b * n_cls,
            transcendentals=b * n_cls + b,
            bytes_accessed=int(logits_p.size) * itemsize
                           + int(labels_col.size) * 4 + 8),
    )(logits_p, labels_col)
    return loss[0, 0], acc[0, 0]


def cross_entropy_loss(logits, label):
    """Mean cross-entropy (matches nn.CrossEntropyLoss default reduction)."""
    return loss_and_accuracy(logits, label)[0]


def accuracy(pred, label, *, tr=None):
    """pred / label: any shape of ints -> scalar float32 accuracy."""
    pred1d = jnp.reshape(pred, (-1,)).astype(jnp.int32)
    label1d = jnp.reshape(label, (-1,)).astype(jnp.int32)
    b = pred1d.shape[0]

    lanes = 128
    rows = -(-b // lanes)
    if tr is None:
        tr = min(1024, _round_up(rows, 8))
    else:
        tr = _round_up(tr, 8)
    rows_pad = _round_up(rows, tr)
    total = rows_pad * lanes

    # Fully packed [rows, 128] slab; pad pred with 0 and label with -1 so the
    # padded tail never counts as correct.
    pred2 = jnp.pad(pred1d, (0, total - b)).reshape(rows_pad, lanes)
    label2 = jnp.pad(label1d, (0, total - b), constant_values=-1)
    label2 = label2.reshape(rows_pad, lanes)

    grid = (rows_pad // tr,)
    kernel = functools.partial(_accuracy_kernel, inv_b=1.0 / float(b))
    out = pl.pallas_call(
        kernel,
        out_shape=jax.ShapeDtypeStruct((1, 1), jnp.float32),
        grid=grid,
        in_specs=[
            pl.BlockSpec((tr, lanes), lambda i: (i, 0)),
            pl.BlockSpec((tr, lanes), lambda i: (i, 0)),
        ],
        out_specs=pl.BlockSpec((1, 1), lambda i: (0, 0),
                               memory_space=pltpu.MemorySpace.SMEM),
        scratch_shapes=[pltpu.SMEM((1,), jnp.float32)],
        compiler_params=pltpu.CompilerParams(
            dimension_semantics=("arbitrary",)),
    )(pred2, label2)
    return out[0, 0]


class FewShotREModelPallas:
    """Pallas port of FewShotREModel (abstract few-shot RE base class)."""

    def __init__(self, sentence_encoder=None):
        # sentence_encoder is an externally-supplied module in the reference
        # code; it has no defined shape/compute at this level.
        self.sentence_encoder = sentence_encoder

    def forward(self, support, query, N, K, Q):
        # Matches the reference module exactly (abstract).
        raise NotImplementedError

    def loss(self, logits, label):
        return loss_and_accuracy(logits, label)[0]

    def accuracy(self, pred, label):
        return accuracy(pred, label)

    def loss_and_accuracy(self, logits, label):
        # Fused fast path: loss + argmax + accuracy in one kernel launch.
        return loss_and_accuracy(logits, label)


# ----------------------------------------------------------------------------
# Main
# ----------------------------------------------------------------------------
if __name__ == "__main__":
    # Small few-shot episode: N=5 classes, Q=4 query instances per class.
    N_way, Q_per = 5, 4
    B = N_way * Q_per  # 20 flattened query instances

    key = jax.random.PRNGKey(0)
    k_logits, k_label = jax.random.split(key)
    logits = jax.random.normal(k_logits, (N_way * Q_per, N_way), dtype=jnp.float32)
    label = jax.random.randint(k_label, (N_way * Q_per,), 0, N_way, dtype=jnp.int32)
    pred = jnp.argmax(logits, axis=-1).astype(jnp.int32)

    model = FewShotREModelPallas(sentence_encoder=None)

    loss_val, acc_val = model.loss_and_accuracy(logits, label)
    loss_only = model.loss(logits, label)
    acc_sep = model.accuracy(pred, label)
    jax.block_until_ready((loss_val, acc_val, loss_only, acc_sep))

    # Pure-JAX reference (log-softmax CE mean, equality mean).
    logp_ref = jax.nn.log_softmax(logits, axis=-1)
    loss_ref = -jnp.mean(logp_ref[jnp.arange(B), label])
    acc_ref = jnp.mean((pred == label).astype(jnp.float32))

    assert jnp.allclose(loss_val, loss_ref, atol=1e-5, rtol=1e-5), (loss_val, loss_ref)
    assert jnp.allclose(loss_only, loss_ref, atol=1e-5, rtol=1e-5), (loss_only, loss_ref)
    assert jnp.allclose(acc_val, acc_ref, atol=1e-6), (acc_val, acc_ref)
    assert jnp.allclose(acc_sep, acc_ref, atol=1e-6), (acc_sep, acc_ref)

    # Multi-tile grid path (bf16 logits, grid accumulation + batch padding).
    B2, N2 = 300, 7
    k1, k2 = jax.random.split(jax.random.PRNGKey(1))
    logits2 = jax.random.normal(k1, (B2, N2), dtype=jnp.bfloat16)
    label2 = jax.random.randint(k2, (B2,), 0, N2, dtype=jnp.int32)
    loss2, acc2 = loss_and_accuracy(logits2, label2, tb=128)     # grid = (3,)
    pred2 = jnp.argmax(logits2.astype(jnp.float32), axis=-1).astype(jnp.int32)
    jax.block_until_ready((loss2, acc2))

    logp2 = jax.nn.log_softmax(logits2.astype(jnp.float32), axis=-1)
    loss2_ref = -jnp.mean(logp2[jnp.arange(B2), label2])
    acc2_ref = jnp.mean((pred2 == label2).astype(jnp.float32))
    assert jnp.allclose(loss2, loss2_ref, atol=1e-4, rtol=1e-4), (loss2, loss2_ref)
    assert jnp.allclose(acc2, acc2_ref, atol=1e-6), (acc2, acc2_ref)

    # Standalone accuracy on an arbitrarily-shaped pred/label (view(-1) path),
    # forced into a multi-step grid (rows=20 -> 3 tiles of 8 rows).
    k3, k4 = jax.random.split(jax.random.PRNGKey(2))
    pred3 = jax.random.randint(k3, (25, 100), 0, 10, dtype=jnp.int32)
    label3 = jax.random.randint(k4, (25, 100), 0, 10, dtype=jnp.int32)
    acc3 = accuracy(pred3, label3, tr=8)
    jax.block_until_ready(acc3)
    acc3_ref = jnp.mean((pred3.reshape(-1) == label3.reshape(-1)).astype(jnp.float32))
    assert jnp.allclose(acc3, acc3_ref, atol=1e-6), (acc3, acc3_ref)

    print("KERNEL_OK")
</pallas_src>

<mosaic_0001>
module attributes {stable_mosaic.version = 11 : i64} {
  func.func @_loss_acc_kernel(%arg0: i32, %arg1: memref<24x5xf32, #tpu.memory_space<vmem>>, %arg2: memref<24x1xi32, #tpu.memory_space<vmem>>, %arg3: memref<1x1xf32, #tpu.memory_space<smem>>, %arg4: memref<1x1xf32, #tpu.memory_space<smem>>, %arg5: memref<2xf32, #tpu.memory_space<smem>>) attributes {dimension_semantics = [#tpu.dimension_semantics<arbitrary>], iteration_bounds = array<i64: 1>, scalar_prefetch = 0 : i64, scratch_operands = 1 : i64, tpu.core_type = #tpu.core_type<tc>, window_params = [{transform_indices = @transform_0, window_bounds = array<i64: 24, 5>}, {transform_indices = @transform_1, window_bounds = array<i64: 24, 1>}, {transform_indices = @transform_2, window_bounds = array<i64: 1, 1>}, {transform_indices = @transform_3, window_bounds = array<i64: 1, 1>}]} {
    %c0_i32 = arith.constant 0 : i32
    %0 = arith.cmpi eq, %arg0, %c0_i32 : i32
    %1 = arith.extui %0 : i1 to i32
    %c0_i32_0 = arith.constant 0 : i32
    %2 = arith.cmpi ne, %1, %c0_i32_0 : i32
    scf.if %2 {
      %cst_16 = arith.constant 0.000000e+00 : f32
      %c0_17 = arith.constant 0 : index
      %52 = memref.load %arg5[%c0_17] : memref<2xf32, #tpu.memory_space<smem>>
      memref.store %cst_16, %arg5[%c0_17] : memref<2xf32, #tpu.memory_space<smem>>
      %cst_18 = arith.constant 0.000000e+00 : f32
      %c1_19 = arith.constant 1 : index
      %53 = memref.load %arg5[%c1_19] : memref<2xf32, #tpu.memory_space<smem>>
      memref.store %cst_18, %arg5[%c1_19] : memref<2xf32, #tpu.memory_space<smem>>
    } else {
    }
    %c0 = arith.constant 0 : index
    %c0_1 = arith.constant 0 : index
    %3 = vector.load %arg1[%c0, %c0_1] : memref<24x5xf32, #tpu.memory_space<vmem>>, vector<24x5xf32>
    %c0_2 = arith.constant 0 : index
    %c0_3 = arith.constant 0 : index
    %4 = vector.load %arg2[%c0_2, %c0_3] : memref<24x1xi32, #tpu.memory_space<vmem>>, vector<24x1xi32>
    %cst = arith.constant dense<0xFF800000> : vector<24xf32>
    %5 = vector.multi_reduction <maximumf>, %3, %cst [1] : vector<24x5xf32> to vector<24xf32>
    %6 = vector.shape_cast %5 : vector<24xf32> to vector<24x1xf32>
    %7 = vector.broadcast %6 : vector<24x1xf32> to vector<24x5xf32>
    %8 = arith.subf %3, %7 : vector<24x5xf32>
    %9 = math.exp %8 : vector<24x5xf32>
    %cst_4 = arith.constant dense<0.000000e+00> : vector<24xf32>
    %10 = vector.multi_reduction <add>, %9, %cst_4 [1] : vector<24x5xf32> to vector<24xf32>
    %11 = vector.shape_cast %10 : vector<24xf32> to vector<24x1xf32>
    %12 = math.log %11 : vector<24x1xf32>
    %13 = vector.broadcast %12 : vector<24x1xf32> to vector<24x5xf32>
    %14 = arith.subf %8, %13 : vector<24x5xf32>
    %15 = tpu.iota {dimensions = array<i32: 1>} : vector<24x5xi32>
    %16 = vector.broadcast %4 : vector<24x1xi32> to vector<24x5xi32>
    %17 = arith.cmpi eq, %15, %16 : vector<24x5xi32>
    %18 = arith.extui %17 : vector<24x5xi1> to vector<24x5xi32>
    %19 = arith.sitofp %18 : vector<24x5xi32> to vector<24x5xf32>
    %20 = arith.mulf %19, %14 : vector<24x5xf32>
    %21 = vector.shape_cast %20 : vector<24x5xf32> to vector<1x24x5xf32>
    %cst_5 = arith.constant dense<0.000000e+00> : vector<1xf32>
    %22 = vector.multi_reduction <add>, %21, %cst_5 [1, 2] : vector<1x24x5xf32> to vector<1xf32>
    %23 = vector.shape_cast %22 : vector<1xf32> to vector<1x1x1xf32>
    %24 = vector.extract %23[0, 0, 0] : f32 from vector<1x1x1xf32>
    %cst_6 = arith.constant 0.000000e+00 : f32
    %25 = arith.subf %cst_6, %24 : f32
    %26 = vector.broadcast %6 : vector<24x1xf32> to vector<24x5xf32>
    %27 = arith.cmpf oeq, %3, %26 : vector<24x5xf32>
    %c0_i32_7 = arith.constant 0 : i32
    %28 = vector.broadcast %c0_i32_7 : i32 to vector<24x5xi32>
    %29 = arith.subi %28, %15 : vector<24x5xi32>
    %c-5_i32 = arith.constant -5 : i32
    %30 = vector.broadcast %c-5_i32 : i32 to vector<24x5xi32>
    %31 = arith.select %27, %29, %30 : vector<24x5xi1>, vector<24x5xi32>
    %cst_8 = arith.constant dense<-2147483648> : vector<24xi32>
    %32 = vector.multi_reduction <maxsi>, %31, %cst_8 [1] : vector<24x5xi32> to vector<24xi32>
    %33 = vector.shape_cast %32 : vector<24xi32> to vector<24x1xi32>
    %c0_i32_9 = arith.constant 0 : i32
    %34 = vector.broadcast %c0_i32_9 : i32 to vector<24x1xi32>
    %35 = arith.subi %34, %33 : vector<24x1xi32>
    %36 = arith.cmpi eq, %35, %4 : vector<24x1xi32>
    %37 = arith.extui %36 : vector<24x1xi1> to vector<24x1xi32>
    %38 = arith.sitofp %37 : vector<24x1xi32> to vector<24x1xf32>
    %39 = vector.shape_cast %38 : vector<24x1xf32> to vector<1x24x1xf32>
    %cst_10 = arith.constant dense<0.000000e+00> : vector<1xf32>
    %40 = vector.multi_reduction <add>, %39, %cst_10 [1, 2] : vector<1x24x1xf32> to vector<1xf32>
    %41 = vector.shape_cast %40 : vector<1xf32> to vector<1x1x1xf32>
    %42 = vector.extract %41[0, 0, 0] : f32 from vector<1x1x1xf32>
    %c0_11 = arith.constant 0 : index
    %43 = memref.load %arg5[%c0_11] : memref<2xf32, #tpu.memory_space<smem>>
    %44 = arith.addf %43, %25 : f32
    %c0_12 = arith.constant 0 : index
    %45 = memref.load %arg5[%c0_12] : memref<2xf32, #tpu.memory_space<smem>>
    memref.store %44, %arg5[%c0_12] : memref<2xf32, #tpu.memory_space<smem>>
    %c1 = arith.constant 1 : index
    %46 = memref.load %arg5[%c1] : memref<2xf32, #tpu.memory_space<smem>>
    %47 = arith.addf %46, %42 : f32
    %c1_13 = arith.constant 1 : index
    %48 = memref.load %arg5[%c1_13] : memref<2xf32, #tpu.memory_space<smem>>
    memref.store %47, %arg5[%c1_13] : memref<2xf32, #tpu.memory_space<smem>>
    %c0_i32_14 = arith.constant 0 : i32
    %49 = arith.cmpi eq, %arg0, %c0_i32_14 : i32
    %50 = arith.extui %49 : i1 to i32
    %c0_i32_15 = arith.constant 0 : i32
    %51 = arith.cmpi ne, %50, %c0_i32_15 : i32
    scf.if %51 {
      %c0_16 = arith.constant 0 : index
      %52 = memref.load %arg5[%c0_16] : memref<2xf32, #tpu.memory_space<smem>>
      %cst_17 = arith.constant 5.000000e-02 : f32
      %53 = arith.mulf %52, %cst_17 : f32
      %c0_18 = arith.constant 0 : index
      %c0_19 = arith.constant 0 : index
      %54 = memref.load %arg3[%c0_18, %c0_19] : memref<1x1xf32, #tpu.memory_space<smem>>
      memref.store %53, %arg3[%c0_18, %c0_19] : memref<1x1xf32, #tpu.memory_space<smem>>
      %c1_20 = arith.constant 1 : index
      %55 = memref.load %arg5[%c1_20] : memref<2xf32, #tpu.memory_space<smem>>
      %cst_21 = arith.constant 5.000000e-02 : f32
      %56 = arith.mulf %55, %cst_21 : f32
      %c0_22 = arith.constant 0 : index
      %c0_23 = arith.constant 0 : index
      %57 = memref.load %arg4[%c0_22, %c0_23] : memref<1x1xf32, #tpu.memory_space<smem>>
      memref.store %56, %arg4[%c0_22, %c0_23] : memref<1x1xf32, #tpu.memory_space<smem>>
    } else {
    }
    return
  }
  func.func @transform_0(%arg0: i32) -> (i32, i32) {
    %c0_i32 = arith.constant 0 : i32
    %c0_i32_0 = arith.constant 0 : i32
    return %arg0, %c0_i32 : i32, i32
  }
  func.func @transform_1(%arg0: i32) -> (i32, i32) {
    %c0_i32 = arith.constant 0 : i32
    %c0_i32_0 = arith.constant 0 : i32
    return %arg0, %c0_i32 : i32, i32
  }
  func.func @transform_2(%arg0: i32) -> (i32, i32) {
    %c0_i32 = arith.constant 0 : i32
    %c0_i32_0 = arith.constant 0 : i32
    %c0_i32_1 = arith.constant 0 : i32
    return %c0_i32, %c0_i32_0 : i32, i32
  }
  func.func @transform_3(%arg0: i32) -> (i32, i32) {
    %c0_i32 = arith.constant 0 : i32
    %c0_i32_0 = arith.constant 0 : i32
    %c0_i32_1 = arith.constant 0 : i32
    return %c0_i32, %c0_i32_0 : i32, i32
  }
}

</mosaic_0001>

<bundles_post_ra>
// kernel: tpu_custom_call.1
= control target key start
LH: loop header
LB: loop body
LE: loop exit
PB: predicated region body
PF: predicated region fallthrough
CT: control target
= control target key end

     0   :  { %9 = vsyncpa [#allocation4], 0  ;;  %vm29_vm0 = vcmask 39936   ;;  %s380_s0 = inlined_call_operand.vmem [shape: f32[24,5], index: 0, kind: input, shape index: {}]   ;;  %s381_s1 = inlined_call_operand.vmem [shape: s32[24,1], index: 1, kind: input, shape index: {}]   ;;  %s382_s2 = inlined_call_operand.hbm [shape: f32[1,1], index: 2, kind: output, shape index: {0}]   ;;  %s383_s3 = inlined_call_operand.hbm [shape: f32[1,1], index: 3, kind: output, shape index: {1}]  }
   0x1   :  { %v23_v0 = vld [vmem:[%s380_s0] sm:$0xff]  ;;  %v25_v1 = vld [vmem:[%s380_s0 + $0x10] sm:$0xff]  ;;  %v24_v2 = vld [vmem:[%s380_s0 + $0x8] sm:$0xff] }
   0x2   :  { %v30_v3 = vsel %vm29_vm0, %v23_v0, -inf  ;;  %v36_v4 = vsel %vm29_vm0, %v25_v1, -inf }
   0x3   :  { %10 = vsyncpa [#allocation6], 0  ;;  %31 = vmax.xlane.f32.xlu0 %v30_v3  ;;  %37 = vmax.xlane.f32.xlu1 %v36_v4  ;;  %v33_v5 = vsel %vm29_vm0, %v24_v2, -inf  ;;  %v66_v6 = vlaneseq  ;;  %v281_v36 = vmov 0   ;;  %v27_v45 = vld [vmem:[%s381_s1 + $0x8] sm:$0xff]  ;;  %v26_v46 = vld [vmem:[%s381_s1] sm:$0xff] }
   0x4   :  { %244 = vset.pattern.permute.xlu1 %v281_v36  ;;  %243 = vset.pattern.permute.xlu0 %v281_v36  ;;  %v28_v51 = vld [vmem:[%s381_s1 + $0x10] sm:$0xff]  ;;  %v282_v3 = vmov 0.0   ;;  %vm168_vm8 = vcmask 7168   ;;  %s257_s29 = scalar_lea.hbm %s382_s2, 16 }
   0x5   :  { %v317_v7 = vand.u32 127, %v66_v6  ;;  %p258_p0 = scmp.ne.s32.totalorder %s382_s2, %s257_s29  ;;  %p261_p1 = scmp.lt.u32.totalorder %s257_s29, %s382_s2 }
   0x7   :  { %34 = vmax.xlane.f32.xlu0 %v33_v5  ;;  %v107_v8 = vsub.s32 0, %v317_v7  ;;  %p263_p2 = pnand %p261_p1, %p258_p0 }
  0x90   :  { %v32_v9 = vpop.xlane.xlu0 %31  ;;  %v38_v10 = vpop.xlane.xlu1 %37 }
  0x91   :  { %v320_v11 = vsub.f32 %v23_v0, %v32_v9  ;;  %vm104_vm1 = vcmp.eq.f32.partialorder %v23_v0, %v32_v9  ;;  %v322_v12 = vsub.f32 %v25_v1, %v38_v10  ;;  %vm106_vm2 = vcmp.eq.f32.partialorder %v25_v1, %v38_v10 }
  0x92   :  { %v108_v13 = vsel %vm104_vm1, %v107_v8, 4294967291  ;;  %v110_v14 = vsel %vm106_vm2, %v107_v8, 4294967291 }
  0x93   :  { %v42_v15 = vmul.f32 1.442695, %v320_v11  ;;  %v46_v16 = vmul.f32 1.442695, %v322_v12  ;;  %v111_v17 = vsel %vm29_vm0, %v108_v13, 2147483648  ;;  %v141_v18 = vsel %vm29_vm0, %v110_v14, 2147483648 }
  0x94   :  { %v35_v19 = vpop.xlane.xlu0 %34  ;;  %v113_v20 = vshra.s32 %v111_v17, 16  ;;  %v143_v21 = vshra.s32 %v141_v18, 16  ;;  %v112_v37 = vand.u32 65535, %v111_v17  ;;  %v142_v48 = vand.u32 65535, %v141_v18 }
  0x95   :  { %245 = vpow2.f32 %v42_v15  ;;  %v328_v22 = vsub.f32 %v24_v2, %v35_v19  ;;  %vm105_vm3 = vcmp.eq.f32.partialorder %v24_v2, %v35_v19 }
  0x96   :  { %247 = vpow2.f32 %v46_v16  ;;  %v109_v23 = vsel %vm105_vm3, %v107_v8, 4294967291  ;;  %v115_v24 = vcvt.s32.f32 %v113_v20  ;;  %v145_v27 = vcvt.s32.f32 %v143_v21 }
  0x97   :  { %v44_v25 = vmul.f32 1.442695, %v328_v22  ;;  %v126_v26 = vsel %vm29_vm0, %v109_v23, 2147483648  ;;  %v114_v39 = vcvt.s32.f32 %v112_v37  ;;  %v144_v49 = vcvt.s32.f32 %v142_v48 }
  0x98   :  { %116 = vmax.xlane.f32.xlu1 %v115_v24  ;;  %v128_v28 = vshra.s32 %v126_v26, 16  ;;  %v127_v40 = vand.u32 65535, %v126_v26 }
  0x99   :  { %249 = vpow2.f32 %v44_v25 }
  0x9a   :  { %v130_v29 = vcvt.s32.f32 %v128_v28  ;;  %v129_v43 = vcvt.s32.f32 %v127_v40 }
  0x9c   :  { %146 = vmax.xlane.f32.xlu1 %v145_v27  ;;  %131 = vmax.xlane.f32.xlu0 %v130_v29 }
  0x9f   :  { %v246_v30 = vpop.eup %245 }
  0xa0   :  { %v248_v31 = vpop.eup %247  ;;  %v48_v32 = vsel %vm29_vm0, %v246_v30, 0.0 }
  0xa1   :  { %49 = vadd.xlane.f32.xlu0 %v48_v32  ;;  %v54_v33 = vsel %vm29_vm0, %v248_v31, 0.0 }
  0xa3   :  { %v250_v34 = vpop.eup %249 }
  0xa4   :  { %v51_v35 = vsel %vm29_vm0, %v250_v34, 0.0 }
  0xa5   :  { %55 = vadd.xlane.f32.xlu0 %v54_v33  ;;  %52 = vadd.xlane.f32.xlu1 %v51_v35 }
 0x125   :  { %v117_v38 = vpop.xlane.xlu1 %116 }
 0x126   :  { %vm118_vm4 = vcmp.eq.f32.partialorder %v115_v24, %v117_v38  ;;  %v123_v54 = vcvt.f32.s32 %v117_v38 }
 0x127   :  { %v119_v41 = vsel %vm118_vm4, %v114_v39, -inf }
 0x128   :  { %120 = vmax.xlane.f32.xlu1 %v119_v41  ;;  %v124_v57 = vshll.u32 %v123_v54, 16 }
 0x129   :  { %v132_v42 = vpop.xlane.xlu0 %131  ;;  %v147_v47 = vpop.xlane.xlu1 %146 }
 0x12a   :  { %vm133_vm5 = vcmp.eq.f32.partialorder %v130_v29, %v132_v42  ;;  %vm148_vm6 = vcmp.eq.f32.partialorder %v145_v27, %v147_v47  ;;  %v138_v58 = vcvt.f32.s32 %v132_v42  ;;  %v153_v17 = vcvt.f32.s32 %v147_v47 }
 0x12b   :  { %v134_v44 = vsel %vm133_vm5, %v129_v43, -inf  ;;  %v149_v50 = vsel %vm148_vm6, %v144_v49, -inf }
 0x12c   :  { %135 = vmax.xlane.f32.xlu0 %v134_v44  ;;  %v139_v62 = vshll.u32 %v138_v58, 16  ;;  %v154_v23 = vshll.u32 %v153_v17, 16 }
 0x12e   :  { %v50_v52 = vpop.xlane.xlu0 %49 }
 0x12f   :  { %251 = vlog2.f32 %v50_v52 }
 0x132   :  { %v53_v53 = vpop.xlane.xlu1 %52  ;;  %v56_v55 = vpop.xlane.xlu0 %55 }
 0x133   :  { %253 = vlog2.f32 %v53_v53 }
 0x134   :  { %255 = vlog2.f32 %v56_v55 }
 0x139   :  { %72 = vperm.xlu1 %244, %v27_v45   ;;  %v252_v10 = vpop.eup %251 }
 0x13a   :  { %v58_v16 = vmul.f32 0.6931472, %v252_v10 }
 0x13c   :  { %v63_v21 = vsub.f32 %v320_v11, %v58_v16 }
 0x13d   :  { %v254_v14 = vpop.eup %253 }
 0x13e   :  { %v60_v18 = vmul.f32 0.6931472, %v254_v14  ;;  %v256_v19 = vpop.eup %255 }
 0x13f   :  { %v62_v26 = vmul.f32 0.6931472, %v256_v19 }
 0x140   :  { %v64_v27 = vsub.f32 %v328_v22, %v60_v18 }
 0x141   :  { %v65_v34 = vsub.f32 %v322_v12, %v62_v26 }
 0x142   :  { %69 = vperm.xlu0 %243, %v26_v46  }
 0x15d   :  { %150 = vmax.xlane.f32.xlu1 %v149_v50 }
 0x16e   :  { %75 = vperm.xlu1 %244, %v28_v51  }
 0x1b5   :  { %v121_v56 = vpop.xlane.xlu1 %120 }
 0x1b6   :  { %v122_v59 = vcvt.f32.s32 %v121_v56 }
 0x1b8   :  { %v125_v60 = vadd.s32 %v124_v57, %v122_v59 }
 0x1b9   :  { %v136_v61 = vpop.xlane.xlu0 %135  ;;  %v73_v15 = vpop.permute.xlu1 %72 }
 0x1ba   :  { %v156_v63 = vsub.s32 0, %v125_v60  ;;  %v137_v0 = vcvt.f32.s32 %v136_v61  ;;  %vm78_vm11 = vcmp.eq.s32.totalorder %v317_v7, %v73_v15 }
 0x1bb   :  { %v228_v24 = vsel %vm78_vm11, 1.0, %v282_v3 }
 0x1bc   :  { %vm159_vm7 = vcmp.eq.s32.totalorder %v156_v63, %v26_v46  ;;  %v140_v1 = vadd.s32 %v139_v62, %v137_v0  ;;  %v87_v30 = vmul.f32 %v228_v24, %v64_v27 }
 0x1bd   :  { %v230_v4 = vsel %vm159_vm7, 1.0, %v282_v3 }
 0x1be   :  { %v157_v2 = vsub.s32 0, %v140_v1  ;;  %v169_v6 = vsel %vm168_vm8, %v230_v4, 0.0  ;;  %v90_v37 = vsel %vm29_vm0, %v87_v30, 0.0 }
 0x1c0   :  { %vm160_vm9 = vcmp.eq.s32.totalorder %v157_v2, %v27_v45 }
 0x1c1   :  { %v231_v5 = vsel %vm160_vm9, 1.0, %v282_v3  ;;  %v70_v13 = vpop.permute.xlu0 %69 }
 0x1c2   :  { %v170_v8 = vsel %vm168_vm8, %v231_v5, 0.0  ;;  %vm77_vm10 = vcmp.eq.s32.totalorder %v317_v7, %v70_v13 }
 0x1c3   :  { %v171_v9 = vadd.f32 %v170_v8, %v169_v6  ;;  %v227_v20 = vsel %vm77_vm10, 1.0, %v282_v3 }
 0x1c4   :  { %v86_v28 = vmul.f32 %v227_v20, %v63_v21 }
 0x1c6   :  { %v89_v35 = vsel %vm29_vm0, %v86_v28, 0.0 }
 0x1c7   :  { %v91_v39 = vadd.f32 %v90_v37, %v89_v35 }
 0x1ea   :  { %v151_v25 = vpop.xlane.xlu1 %150 }
 0x1eb   :  { %v152_v29 = vcvt.f32.s32 %v151_v25 }
 0x1ed   :  { %v155_v31 = vadd.s32 %v154_v23, %v152_v29 }
 0x1ee   :  { %v76_v32 = vpop.permute.xlu1 %75 }
 0x1ef   :  { %v158_v33 = vsub.s32 0, %v155_v31  ;;  %vm79_vm12 = vcmp.eq.s32.totalorder %v317_v7, %v76_v32 }
 0x1f0   :  { %v229_v36 = vsel %vm79_vm12, 1.0, %v282_v3 }
 0x1f1   :  { %v88_v11 = vmul.f32 %v229_v36, %v65_v34  ;;  %vm161_vm13 = vcmp.eq.s32.totalorder %v158_v33, %v28_v51 }
 0x1f2   :  { %v232_v38 = vsel %vm161_vm13, 1.0, %v282_v3 }
 0x1f3   :  { %v172_v22 = vsel %vm168_vm8, %v232_v38, 0.0  ;;  %v92_v40 = vsel %vm29_vm0, %v88_v11, 0.0 }
 0x1f4   :  { %v173_v41 = vadd.f32 %v172_v22, %v171_v9  ;;  %v93_v42 = vadd.f32 %v92_v40, %v91_v39 }
 0x1f6   :  { %174 = vadd.xlane.f32.xlu0 %v173_v41  ;;  %94 = vadd.xlane.f32.xlu1 %v93_v42 }
 0x283   :  { %v175_v12 = vpop.xlane.xlu0 %174  ;;  %v95_v43 = vpop.xlane.xlu1 %94 }
 0x284   :  { %v176_v7 = vrot.slane %v175_v12, 4  ;;  %v96_v44 = vrot.slane %v95_v43, 4 }
 0x286   :  { %v177_v45 = vadd.f32 %v176_v7, %v175_v12  ;;  %v97_v46 = vadd.f32 %v96_v44, %v95_v43 }
 0x288   :  { %v178_v47 = vrot.slane %v177_v45, 2  ;;  %v98_v48 = vrot.slane %v97_v46, 2 }
 0x28a   :  { %v179_v49 = vadd.f32 %v178_v47, %v177_v45  ;;  %v99_v50 = vadd.f32 %v98_v48, %v97_v46 }
 0x28c   :  { %v100_v51 = vrot.slane %v99_v50, 1  ;;  %v180_v52 = vrot.slane %v179_v49, 1 }
 0x28e   :  { %v101_v53 = vadd.f32 %v100_v51, %v99_v50  ;;  %v181_v54 = vadd.f32 %v180_v52, %v179_v49 }
 0x290   :  { %235 = vpush %v101_v53 }
 0x291   :  { %237 = vpush %v181_v54 }
 0x2c1   :  { %s236_s1 = spop %235 }
 0x2c2   :  { %s103_s23 = ssub.f32 0.0, %s236_s1  ;;  %s238_s24 = spop %237 }
 0x2c3   :  { %s199_s25 = smul.f32 0.05, %s238_s24 }
 0x2c4   :  { %s195_s26 = smul.f32 0.05, %s103_s23 }
 0x2c5   :  { %201 = sst [smem:[#allocation5]] %s199_s25 }
 0x2c6   :  { %197 = sst [smem:[#allocation3]] %s195_s26 }
 0x2c7   :  { %266 = shalt.err (!%p263_p2)
}
 0x2c8   :  { %s283_s7 = smov [#allocation3]   ;;  %s267_s12 = scalar_lea.hbm %s383_s3, 16 }
 0x2c9   :  { %209 = dma.smem_to_hbm %s283_s7, 16, %s382_s2, [#allocation4]  }
 0x2ca   :  { %p268_p3 = scmp.ne.s32.totalorder %s383_s3, %s267_s12  ;;  %p271_p4 = scmp.lt.u32.totalorder %s267_s12, %s383_s3 }
 0x2cc   :  { %p273_p5 = pnand %p271_p4, %p268_p3 }
 0x2ce   :  { %276 = shalt.err (!%p273_p5)
}
 0x2cf   :  { %s284_s17 = smov [#allocation5]  }
 0x2d0   :  { %217 = dma.smem_to_hbm %s284_s17, 16, %s383_s3, [#allocation6]  }
 0x2d1   :  { %277 = dma.done.wait [#allocation4], 16  }
 0x2d2   :  { %278 = vsyncadd [#allocation4], 4294967280 }
 0x2d3   :  { %279 = dma.done.wait [#allocation6], 16  }
 0x2d4   :  { %280 = vsyncadd [#allocation6], 4294967280 }
 0x2d5   :  { %224 = sfence }
 0x2d6   :  { %225 = vsyncpa [#allocation4], 1 }
 0x2d7   :  { %226 = vsyncpa [#allocation6], 1 }

</bundles_post_ra>
